<compile_context>
chip_gen: v5e
topology: v5e:2x2
jax: 0.10.0
libtpu: 0.0.40
codegen_flags: <defaults>
</compile_context>

<pallas_src>
import functools

import jax
import jax.numpy as jnp
from jax.experimental import pallas as pl
from jax.experimental.pallas import tpu as pltpu


def _fused_conv_kernel(p_ref, w_ref, o_ref):
    # p_ref : (tile_m, K_pad)     im2col patches (ones-column for bias folded in)
    # w_ref : (K_pad, NOUT_PAD)   fused weight+bias, output cols zero-padded to 128
    # o_ref : (tile_m, NOUT_PAD)  conv output tile, ReLU applied, lane-dense
    acc = jnp.dot(p_ref[...], w_ref[...], preferred_element_type=jnp.float32)
    o_ref[...] = jnp.maximum(acc, 0.0).astype(o_ref.dtype)


def _round_up(v, m):
    return (v + m - 1) // m * m


def resize_conv(x_nchw, weight_oihw, bias, scale_factor=2):
    """Pallas implementation of ResizeConv.forward.

    x_nchw      : (N, Cin, H, W) float32
    weight_oihw : (Cout, Cin, 3, 3) float32   (PyTorch conv layout)
    bias        : (Cout,) float32
    returns     : (N, Cout, H*r, W*r) float32
    """
    r = scale_factor
    N, Cin, H, W = x_nchw.shape
    Cout = weight_oihw.shape[0]
    Hr, Wr = H * r, W * r

    # --- glue: nearest upsample (matches F.interpolate nearest for int scale),
    #           NCHW -> NHWC, spatial zero pad (padding=1) ---
    x_nhwc = jnp.transpose(x_nchw, (0, 2, 3, 1))                   # (N, H, W, Cin)
    x_up = jnp.repeat(jnp.repeat(x_nhwc, r, axis=1), r, axis=2)    # (N, Hr, Wr, Cin)
    x_pad = jnp.pad(x_up, ((0, 0), (1, 1), (1, 1), (0, 0)))        # (N, Hr+2, Wr+2, Cin)

    # --- glue: im2col, tap-major then Cin -> (M, 9*Cin) ---
    cols = [x_pad[:, ky:ky + Hr, kx:kx + Wr, :]
            for ky in range(3) for kx in range(3)]
    M = N * Hr * Wr
    K = 9 * Cin
    patches = jnp.concatenate(cols, axis=-1).reshape(M, K)

    K_pad = _round_up(K + 1, 8)       # +1 ones-column for the folded bias
    NOUT_PAD = _round_up(Cout, 128)   # lane-dense output columns

    patches = jnp.concatenate(
        [patches,
         jnp.ones((M, 1), patches.dtype),
         jnp.zeros((M, K_pad - K - 1), patches.dtype)], axis=-1)   # (M, K_pad)

    # fused weight: rows [0:K) = conv taps, row K = bias, rest zero; cols >= Cout zero
    w2d = jnp.transpose(weight_oihw, (2, 3, 1, 0)).reshape(K, Cout)
    w_fused = jnp.zeros((K_pad, NOUT_PAD), jnp.float32)
    w_fused = w_fused.at[:K, :Cout].set(w2d.astype(jnp.float32))
    w_fused = w_fused.at[K, :Cout].set(bias.astype(jnp.float32))

    # --- pick M tiling: multiples of 8 rows, ~1024 rows/step, >=2 parallel steps ---
    if M >= 2048:
        tile_m = 1024
    else:
        tile_m = max(8, _round_up(_round_up(M, 2) // 2, 8))
    num_steps = pl.cdiv(M, tile_m)
    M_pad = num_steps * tile_m
    if M_pad != M:
        patches = jnp.pad(patches, ((0, M_pad - M), (0, 0)))

    conv = pl.pallas_call(
        _fused_conv_kernel,
        out_shape=jax.ShapeDtypeStruct((M_pad, NOUT_PAD), jnp.float32),
        grid_spec=pltpu.PrefetchScalarGridSpec(
            num_scalar_prefetch=0,
            grid=(num_steps,),
            in_specs=[
                pl.BlockSpec((tile_m, K_pad), lambda i: (i, 0)),
                pl.BlockSpec((K_pad, NOUT_PAD), lambda i: (0, 0)),
            ],
            out_specs=pl.BlockSpec((tile_m, NOUT_PAD), lambda i: (i, 0)),
        ),
        compiler_params=pltpu.CompilerParams(
            dimension_semantics=("parallel",),
            vmem_limit_bytes=32 * 1024 * 1024,
        ),
    )(patches, w_fused)

    # --- glue: drop row/column padding, back to NCHW ---
    y = conv[:M, :Cout].reshape(N, Hr, Wr, Cout)
    return jnp.transpose(y, (0, 3, 1, 2))


def _reference(x_nchw, weight_oihw, bias, scale_factor=2):
    """Pure-JAX reference matching the PyTorch ResizeConv semantics."""
    r = scale_factor
    x_up = jnp.repeat(jnp.repeat(x_nchw, r, axis=2), r, axis=3)
    y = jax.lax.conv_general_dilated(
        x_up, weight_oihw, window_strides=(1, 1),
        padding=((1, 1), (1, 1)),
        dimension_numbers=("NCHW", "OIHW", "NCHW"))
    y = y + bias[None, :, None, None]
    return jnp.maximum(y, 0.0)


if __name__ == "__main__":
    key = jax.random.PRNGKey(0)
    k_x, k_w, k_b = jax.random.split(key, 3)

    # Small shapes consistent with the module: batch=2, in_chans=4,
    # out_chans=4, scale_factor=2, spatial 16x16 (upsampled to 32x32).
    N, Cin, H, W = 2, 4, 16, 16
    out_chans, scale = 4, 2

    x = jax.random.normal(k_x, (N, Cin, H, W), dtype=jnp.float32)
    # Deterministic conv parameter init (PyTorch-like fan-in scaling).
    fan_in = Cin * 3 * 3
    bound = 1.0 / (fan_in ** 0.5)
    weight = jax.random.uniform(k_w, (out_chans, Cin, 3, 3),
                                minval=-bound, maxval=bound,
                                dtype=jnp.float32)
    bias = jax.random.uniform(k_b, (out_chans,), minval=-bound, maxval=bound,
                              dtype=jnp.float32)

    fn = jax.jit(functools.partial(resize_conv, scale_factor=scale))
    out = fn(x, weight, bias)
    out = jax.block_until_ready(out)

    ref = _reference(x, weight, bias, scale_factor=scale)
    assert out.shape == (N, out_chans, H * scale, W * scale), out.shape
    assert jnp.allclose(out, ref, atol=1e-4, rtol=1e-4)

    print("KERNEL_OK")
</pallas_src>

<mosaic_0001>
module attributes {stable_mosaic.version = 11 : i64} {
  func.func @_fused_conv_kernel(%arg0: i32, %arg1: memref<1024x40xf32, #tpu.memory_space<vmem>>, %arg2: memref<40x128xf32, #tpu.memory_space<vmem>>, %arg3: memref<1024x128xf32, #tpu.memory_space<vmem>>) attributes {dimension_semantics = [#tpu.dimension_semantics<parallel>], iteration_bounds = array<i64: 2>, scalar_prefetch = 0 : i64, scratch_operands = 0 : i64, tpu.core_type = #tpu.core_type<tc>, window_params = [{transform_indices = @transform_0, window_bounds = array<i64: 1024, 40>}, {pipeline_mode = #tpu.pipeline_mode<synchronous>, transform_indices = @transform_1, window_bounds = array<i64: 40, 128>}, {transform_indices = @transform_2, window_bounds = array<i64: 1024, 128>}]} {
    %c0 = arith.constant 0 : index
    %c0_0 = arith.constant 0 : index
    %0 = vector.load %arg1[%c0, %c0_0] : memref<1024x40xf32, #tpu.memory_space<vmem>>, vector<1024x40xf32>
    %c0_1 = arith.constant 0 : index
    %c0_2 = arith.constant 0 : index
    %1 = vector.load %arg2[%c0_1, %c0_2] : memref<40x128xf32, #tpu.memory_space<vmem>>, vector<40x128xf32>
    %cst = arith.constant dense<0.000000e+00> : vector<1024x128xf32>
    %2 = tpu.matmul %0, %1, %cst {dimension_numbers = #tpu.dot_dimension_numbers<[1], [0], [0], [1], [0, 0, 1, 1], [], []>} : vector<1024x40xf32>, vector<40x128xf32>, vector<1024x128xf32> -> vector<1024x128xf32>
    %cst_3 = arith.constant 0.000000e+00 : f32
    %3 = vector.broadcast %cst_3 : f32 to vector<1024x128xf32>
    %4 = arith.maximumf %2, %3 : vector<1024x128xf32>
    %c0_4 = arith.constant 0 : index
    %c0_5 = arith.constant 0 : index
    %5 = vector.load %arg3[%c0_4, %c0_5] : memref<1024x128xf32, #tpu.memory_space<vmem>>, vector<1024x128xf32>
    tpu.vector_store %arg3[%c0_4, %c0_5], %4 {strides = array<i32>} : memref<1024x128xf32, #tpu.memory_space<vmem>>, vector<1024x128xf32>,
    return
  }
  func.func @transform_0(%arg0: i32) -> (i32, i32) {
    %c0_i32 = arith.constant 0 : i32
    %c0_i32_0 = arith.constant 0 : i32
    return %arg0, %c0_i32 : i32, i32
  }
  func.func @transform_1(%arg0: i32) -> (i32, i32) {
    %c0_i32 = arith.constant 0 : i32
    %c0_i32_0 = arith.constant 0 : i32
    %c0_i32_1 = arith.constant 0 : i32
    return %c0_i32, %c0_i32_0 : i32, i32
  }
  func.func @transform_2(%arg0: i32) -> (i32, i32) {
    %c0_i32 = arith.constant 0 : i32
    %c0_i32_0 = arith.constant 0 : i32
    return %arg0, %c0_i32 : i32, i32
  }
}

</mosaic_0001>

<bundles_post_ra>
// kernel: resize_conv.1
= control target key start
LH: loop header
LB: loop body
LE: loop exit
PB: predicated region body
PF: predicated region fallthrough
CT: control target
= control target key end

     0   :  { %s1563_s9 = smov 0   ;;  %s1990_s0 = inlined_call_operand.vmem [shape: f32[2048,40], index: 0, kind: input, shape index: {}]   ;;  %s1991_s1 = inlined_call_operand.vmem [shape: f32[40,128], index: 1, kind: input, shape index: {}]   ;;  %s1992_s2 = inlined_call_operand.vmem [shape: f32[2048,128], index: 2, kind: output, shape index: {}]  }
   0x1 LB: > { %s1378_s10 = sadd.s32 4294967295, %s1546_s9   ;;  %p1382_p0 = scmp.ge.s32.totalorder %s1546_s9, 1  ;;  %s1546_s9 = sphi %s1563_s9, %s12_s9  }
   0x2   : > { %p113_p1 = scmp.lt.s32.totalorder %s1546_s9, 3 }
   0x4   : > { %p114_p2 = pnand %p1382_p0, %p113_p1 }
   0x5   : > { %s1383_s15 = sshll.u32 (!%p114_p2), %s1378_s10, 7 }
   0x6   : > { %117 = sbr.rel (%p114_p2) target bundleno = 405 (0x195), region = 28  ;;  %p136_p3 = scmp.lt.s32.totalorder (!%p114_p2), %s1383_s15, 255 }
   0xb   : > { %v279_v0 = vld [vmem:[%s1991_s1 + $0x20] sm:$0xff]  ;;  %v278_v1 = vld [vmem:[%s1991_s1 + $0x18] sm:$0xff]  ;;  %v277_v2 = vld [vmem:[%s1991_s1 + $0x10] sm:$0xff]  ;;  %s1994_s15 = smov (!%p136_p3, %s1383_s15), 255  ;;  %vm280_vm0 = vcmask 326656  }
   0xc   : > { %1518 = vmatpush.msra.mxu2 %v279_v0  ;;  %1519 = vmatpush.msra.mxu3 %v279_v0  ;;  %v276_v3 = vld [vmem:[%s1991_s1 + $0x8] sm:$0xff]  ;;  %s1384_s20 = sshll.u32 %s1994_s15, 3  ;;  %v275_v4 = vld [vmem:[%s1991_s1] sm:$0xff] }
   0xd   : > { %676 = vmatpush.msra.mxu0 %v279_v0  ;;  %1517 = vmatpush.msra.mxu1 %v279_v0  ;;  %s1594_s25 = scalar_lea.vmem %s1990_s0, %s1384_s20  ;;  %s1731_s28 = scalar_lea.vmem %s1992_s2, %s1384_s20 }
   0xe   : > { %1521 = vmatpush.msra.mxu2 %v278_v1  ;;  %1522 = vmatpush.msra.mxu3 %v278_v1  ;;  %v211_v5 = vld [vmem:[%s1594_s25 + $0x200] sm:$0xff]  ;;  %v212_v9 = vld [vmem:[%s1594_s25 + $0x208] sm:$0xff]  ;;  %v213_v13 = vld [vmem:[%s1594_s25 + $0x210] sm:$0xff] }
   0xf   : > { %677 = vmatpush.msra.mxu0 %v278_v1  ;;  %1520 = vmatpush.msra.mxu1 %v278_v1  ;;  %v243_v6 = vld [vmem:[%s1594_s25 + $0x300] sm:$0xff]  ;;  %v244_v10 = vld [vmem:[%s1594_s25 + $0x308] sm:$0xff]  ;;  %v245_v14 = vld [vmem:[%s1594_s25 + $0x310] sm:$0xff] }
  0x10   : > { %1524 = vmatpush.msra.mxu2 %v277_v2  ;;  %1525 = vmatpush.msra.mxu3 %v277_v2  ;;  %v147_v7 = vld [vmem:[%s1594_s25] sm:$0xff]  ;;  %v148_v11 = vld [vmem:[%s1594_s25 + $0x8] sm:$0xff]  ;;  %v149_v15 = vld [vmem:[%s1594_s25 + $0x10] sm:$0xff] }
  0x11   : > { %678 = vmatpush.msra.mxu0 %v277_v2  ;;  %1523 = vmatpush.msra.mxu1 %v277_v2  ;;  %v179_v8 = vld [vmem:[%s1594_s25 + $0x100] sm:$0xff]  ;;  %v180_v12 = vld [vmem:[%s1594_s25 + $0x108] sm:$0xff]  ;;  %v181_v16 = vld [vmem:[%s1594_s25 + $0x110] sm:$0xff] }
  0x12   : > { %1527 = vmatpush.msra.mxu2 %v276_v3  ;;  %1528 = vmatpush.msra.mxu3 %v276_v3  ;;  %v214_v17 = vld [vmem:[%s1594_s25 + $0x218] sm:$0xff]  ;;  %v215_v21 = vld [vmem:[%s1594_s25 + $0x220] sm:$0xff]  ;;  %v216_v25 = vld [vmem:[%s1594_s25 + $0x228] sm:$0xff] }
  0x13   : > { %679 = vmatpush.msra.mxu0 %v276_v3  ;;  %1526 = vmatpush.msra.mxu1 %v276_v3  ;;  %v246_v18 = vld [vmem:[%s1594_s25 + $0x318] sm:$0xff]  ;;  %v247_v22 = vld [vmem:[%s1594_s25 + $0x320] sm:$0xff]  ;;  %v248_v26 = vld [vmem:[%s1594_s25 + $0x328] sm:$0xff] }
  0x14   : > { %1530 = vmatpush.msra.mxu2 %v275_v4  ;;  %1531 = vmatpush.msra.mxu3 %v275_v4  ;;  %v150_v19 = vld [vmem:[%s1594_s25 + $0x18] sm:$0xff]  ;;  %v151_v23 = vld [vmem:[%s1594_s25 + $0x20] sm:$0xff]  ;;  %v152_v27 = vld [vmem:[%s1594_s25 + $0x28] sm:$0xff] }
  0x15   : > { %1451 = vmatmul.msk.f32.vlgmr.msra.gmra.mxu2 %vm280_vm0, %v211_v5  ;;  %1483 = vmatmul.msk.f32.vlgmr.msra.gmra.mxu3 %vm280_vm0, %v243_v6  ;;  %v182_v20 = vld [vmem:[%s1594_s25 + $0x118] sm:$0xff]  ;;  %v183_v24 = vld [vmem:[%s1594_s25 + $0x120] sm:$0xff]  ;;  %v184_v28 = vld [vmem:[%s1594_s25 + $0x128] sm:$0xff] }
  0x16   : > { %680 = vmatpush.msra.mxu0 %v275_v4  ;;  %1529 = vmatpush.msra.mxu1 %v275_v4  ;;  %v217_v29 = vld [vmem:[%s1594_s25 + $0x230] sm:$0xff]  ;;  %v218_v33 = vld [vmem:[%s1594_s25 + $0x238] sm:$0xff]  ;;  %v219_v37 = vld [vmem:[%s1594_s25 + $0x240] sm:$0xff] }
  0x17   : > { %1387 = vmatmul.msk.f32.vlgmr.msra.gmra.mxu0 %vm280_vm0, %v147_v7  ;;  %1419 = vmatmul.msk.f32.vlgmr.msra.gmra.mxu1 %vm280_vm0, %v179_v8  ;;  %v249_v30 = vld [vmem:[%s1594_s25 + $0x330] sm:$0xff]  ;;  %v250_v34 = vld [vmem:[%s1594_s25 + $0x338] sm:$0xff]  ;;  %v251_v38 = vld [vmem:[%s1594_s25 + $0x340] sm:$0xff] }
  0x18   : > { %v153_v31 = vld [vmem:[%s1594_s25 + $0x30] sm:$0xff]  ;;  %v154_v35 = vld [vmem:[%s1594_s25 + $0x38] sm:$0xff]  ;;  %v155_v39 = vld [vmem:[%s1594_s25 + $0x40] sm:$0xff] }
  0x19   : > { %v185_v32 = vld [vmem:[%s1594_s25 + $0x130] sm:$0xff]  ;;  %v186_v36 = vld [vmem:[%s1594_s25 + $0x138] sm:$0xff]  ;;  %v187_v40 = vld [vmem:[%s1594_s25 + $0x140] sm:$0xff] }
  0x1a   : > { %v220_v41 = vld [vmem:[%s1594_s25 + $0x248] sm:$0xff]  ;;  %v221_v45 = vld [vmem:[%s1594_s25 + $0x250] sm:$0xff]  ;;  %v222_v49 = vld [vmem:[%s1594_s25 + $0x258] sm:$0xff] }
  0x1b   : > { %v252_v42 = vld [vmem:[%s1594_s25 + $0x348] sm:$0xff]  ;;  %v253_v46 = vld [vmem:[%s1594_s25 + $0x350] sm:$0xff]  ;;  %v254_v50 = vld [vmem:[%s1594_s25 + $0x358] sm:$0xff] }
  0x1c   : > { %v156_v43 = vld [vmem:[%s1594_s25 + $0x48] sm:$0xff]  ;;  %v157_v47 = vld [vmem:[%s1594_s25 + $0x50] sm:$0xff]  ;;  %v158_v51 = vld [vmem:[%s1594_s25 + $0x58] sm:$0xff] }
  0x1d   : > { %1452 = vmatmul.msk.f32.gmra.mxu2 %vm280_vm0, %v212_v9  ;;  %1484 = vmatmul.msk.f32.gmra.mxu3 %vm280_vm0, %v244_v10  ;;  %v188_v44 = vld [vmem:[%s1594_s25 + $0x148] sm:$0xff]  ;;  %v189_v48 = vld [vmem:[%s1594_s25 + $0x150] sm:$0xff]  ;;  %v190_v52 = vld [vmem:[%s1594_s25 + $0x158] sm:$0xff] }
  0x1e   : > { %v223_v53 = vld [vmem:[%s1594_s25 + $0x260] sm:$0xff]  ;;  %v224_v57 = vld [vmem:[%s1594_s25 + $0x268] sm:$0xff]  ;;  %v225_v61 = vld [vmem:[%s1594_s25 + $0x270] sm:$0xff] }
  0x1f   : > { %1388 = vmatmul.msk.f32.gmra.mxu0 %vm280_vm0, %v148_v11  ;;  %1420 = vmatmul.msk.f32.gmra.mxu1 %vm280_vm0, %v180_v12  ;;  %v255_v54 = vld [vmem:[%s1594_s25 + $0x360] sm:$0xff]  ;;  %v256_v58 = vld [vmem:[%s1594_s25 + $0x368] sm:$0xff]  ;;  %v257_v62 = vld [vmem:[%s1594_s25 + $0x370] sm:$0xff] }
  0x20   : > { %v159_v55 = vld [vmem:[%s1594_s25 + $0x60] sm:$0xff]  ;;  %v160_v59 = vld [vmem:[%s1594_s25 + $0x68] sm:$0xff]  ;;  %v161_v63 = vld [vmem:[%s1594_s25 + $0x70] sm:$0xff] }
  0x21   : > { %v191_v56 = vld [vmem:[%s1594_s25 + $0x160] sm:$0xff]  ;;  %v192_v60 = vld [vmem:[%s1594_s25 + $0x168] sm:$0xff]  ;;  %v193_v0 = vld [vmem:[%s1594_s25 + $0x170] sm:$0xff] }
  0x22   : > { %v226_v1 = vld [vmem:[%s1594_s25 + $0x278] sm:$0xff]  ;;  %v227_v5 = vld [vmem:[%s1594_s25 + $0x280] sm:$0xff] }
  0x23   : > { %v258_v2 = vld [vmem:[%s1594_s25 + $0x378] sm:$0xff]  ;;  %v259_v6 = vld [vmem:[%s1594_s25 + $0x380] sm:$0xff] }
  0x24   : > { %v162_v3 = vld [vmem:[%s1594_s25 + $0x78] sm:$0xff]  ;;  %v163_v9 = vld [vmem:[%s1594_s25 + $0x80] sm:$0xff] }
  0x25   : > { %1453 = vmatmul.msk.f32.gmra.mxu2 %vm280_vm0, %v213_v13  ;;  %1485 = vmatmul.msk.f32.gmra.mxu3 %vm280_vm0, %v245_v14  ;;  %v194_v4 = vld [vmem:[%s1594_s25 + $0x178] sm:$0xff]  ;;  %v195_v10 = vld [vmem:[%s1594_s25 + $0x180] sm:$0xff] }
  0x27   : > { %1389 = vmatmul.msk.f32.gmra.mxu0 %vm280_vm0, %v149_v15  ;;  %1421 = vmatmul.msk.f32.gmra.mxu1 %vm280_vm0, %v181_v16 }
  0x2d   : > { %1454 = vmatmul.msk.f32.gmra.mxu2 %vm280_vm0, %v214_v17  ;;  %1486 = vmatmul.msk.f32.gmra.mxu3 %vm280_vm0, %v246_v18  ;;  %v228_v17 = vld [vmem:[%s1594_s25 + $0x288] sm:$0xff] }
  0x2e   : > { %v260_v18 = vld [vmem:[%s1594_s25 + $0x388] sm:$0xff] }
  0x2f   : > { %1390 = vmatmul.msk.f32.gmra.mxu0 %vm280_vm0, %v150_v19  ;;  %1422 = vmatmul.msk.f32.gmra.mxu1 %vm280_vm0, %v182_v20 }
  0x35   : > { %1455 = vmatmul.msk.f32.gmra.mxu2 %vm280_vm0, %v215_v21  ;;  %1487 = vmatmul.msk.f32.gmra.mxu3 %vm280_vm0, %v247_v22  ;;  %v164_v21 = vld [vmem:[%s1594_s25 + $0x88] sm:$0xff] }
  0x36   : > { %v196_v22 = vld [vmem:[%s1594_s25 + $0x188] sm:$0xff] }
  0x37   : > { %1391 = vmatmul.msk.f32.gmra.mxu0 %vm280_vm0, %v151_v23  ;;  %1423 = vmatmul.msk.f32.gmra.mxu1 %vm280_vm0, %v183_v24 }
  0x3d   : > { %1456 = vmatmul.msk.f32.gmra.mxu2 %vm280_vm0, %v216_v25  ;;  %1488 = vmatmul.msk.f32.gmra.mxu3 %vm280_vm0, %v248_v26 }
  0x3f   : > { %1392 = vmatmul.msk.f32.gmra.mxu0 %vm280_vm0, %v152_v27  ;;  %1424 = vmatmul.msk.f32.gmra.mxu1 %vm280_vm0, %v184_v28 }
  0x45   : > { %1457 = vmatmul.msk.f32.gmra.mxu2 %vm280_vm0, %v217_v29  ;;  %1489 = vmatmul.msk.f32.gmra.mxu3 %vm280_vm0, %v249_v30  ;;  %v229_v29 = vld [vmem:[%s1594_s25 + $0x290] sm:$0xff] }
  0x46   : > { %v261_v30 = vld [vmem:[%s1594_s25 + $0x390] sm:$0xff] }
  0x47   : > { %1393 = vmatmul.msk.f32.gmra.mxu0 %vm280_vm0, %v153_v31  ;;  %1425 = vmatmul.msk.f32.gmra.mxu1 %vm280_vm0, %v185_v32 }
  0x4d   : > { %1458 = vmatmul.msk.f32.gmra.mxu2 %vm280_vm0, %v218_v33  ;;  %1490 = vmatmul.msk.f32.gmra.mxu3 %vm280_vm0, %v250_v34  ;;  %v165_v33 = vld [vmem:[%s1594_s25 + $0x90] sm:$0xff] }
  0x4e   : > { %v197_v34 = vld [vmem:[%s1594_s25 + $0x190] sm:$0xff] }
  0x4f   : > { %1394 = vmatmul.msk.f32.gmra.mxu0 %vm280_vm0, %v154_v35  ;;  %1426 = vmatmul.msk.f32.gmra.mxu1 %vm280_vm0, %v186_v36 }
  0x55   : > { %1459 = vmatmul.msk.f32.gmra.mxu2 %vm280_vm0, %v219_v37  ;;  %1491 = vmatmul.msk.f32.gmra.mxu3 %vm280_vm0, %v251_v38 }
  0x57   : > { %1395 = vmatmul.msk.f32.gmra.mxu0 %vm280_vm0, %v155_v39  ;;  %1427 = vmatmul.msk.f32.gmra.mxu1 %vm280_vm0, %v187_v40 }
  0x5d   : > { %1460 = vmatmul.msk.f32.gmra.mxu2 %vm280_vm0, %v220_v41  ;;  %1492 = vmatmul.msk.f32.gmra.mxu3 %vm280_vm0, %v252_v42  ;;  %v230_v41 = vld [vmem:[%s1594_s25 + $0x298] sm:$0xff] }
  0x5e   : > { %v262_v42 = vld [vmem:[%s1594_s25 + $0x398] sm:$0xff] }
  0x5f   : > { %1396 = vmatmul.msk.f32.gmra.mxu0 %vm280_vm0, %v156_v43  ;;  %1428 = vmatmul.msk.f32.gmra.mxu1 %vm280_vm0, %v188_v44 }
  0x65   : > { %1461 = vmatmul.msk.f32.gmra.mxu2 %vm280_vm0, %v221_v45  ;;  %1493 = vmatmul.msk.f32.gmra.mxu3 %vm280_vm0, %v253_v46  ;;  %v166_v45 = vld [vmem:[%s1594_s25 + $0x98] sm:$0xff] }
  0x66   : > { %v198_v46 = vld [vmem:[%s1594_s25 + $0x198] sm:$0xff] }
  0x67   : > { %1397 = vmatmul.msk.f32.gmra.mxu0 %vm280_vm0, %v157_v47  ;;  %1429 = vmatmul.msk.f32.gmra.mxu1 %vm280_vm0, %v189_v48 }
  0x6d   : > { %1462 = vmatmul.msk.f32.gmra.mxu2 %vm280_vm0, %v222_v49  ;;  %1494 = vmatmul.msk.f32.gmra.mxu3 %vm280_vm0, %v254_v50 }
  0x6f   : > { %1398 = vmatmul.msk.f32.gmra.mxu0 %vm280_vm0, %v158_v51  ;;  %1430 = vmatmul.msk.f32.gmra.mxu1 %vm280_vm0, %v190_v52 }
  0x75   : > { %1463 = vmatmul.msk.f32.gmra.mxu2 %vm280_vm0, %v223_v53  ;;  %1495 = vmatmul.msk.f32.gmra.mxu3 %vm280_vm0, %v255_v54  ;;  %v231_v53 = vld [vmem:[%s1594_s25 + $0x2a0] sm:$0xff] }
  0x76   : > { %v263_v54 = vld [vmem:[%s1594_s25 + $0x3a0] sm:$0xff] }
  0x77   : > { %1399 = vmatmul.msk.f32.gmra.mxu0 %vm280_vm0, %v159_v55  ;;  %1431 = vmatmul.msk.f32.gmra.mxu1 %vm280_vm0, %v191_v56 }
  0x7d   : > { %1464 = vmatmul.msk.f32.gmra.mxu2 %vm280_vm0, %v224_v57  ;;  %1496 = vmatmul.msk.f32.gmra.mxu3 %vm280_vm0, %v256_v58  ;;  %v167_v57 = vld [vmem:[%s1594_s25 + $0xa0] sm:$0xff] }
  0x7e   : > { %v199_v58 = vld [vmem:[%s1594_s25 + $0x1a0] sm:$0xff] }
  0x7f   : > { %1400 = vmatmul.msk.f32.gmra.mxu0 %vm280_vm0, %v160_v59  ;;  %1432 = vmatmul.msk.f32.gmra.mxu1 %vm280_vm0, %v192_v60 }
  0x85   : > { %1465 = vmatmul.msk.f32.gmra.mxu2 %vm280_vm0, %v225_v61  ;;  %1497 = vmatmul.msk.f32.gmra.mxu3 %vm280_vm0, %v257_v62 }
  0x87   : > { %1401 = vmatmul.msk.f32.gmra.mxu0 %vm280_vm0, %v161_v63  ;;  %1433 = vmatmul.msk.f32.gmra.mxu1 %vm280_vm0, %v193_v0 }
  0x8d   : > { %1466 = vmatmul.msk.f32.gmra.mxu2 %vm280_vm0, %v226_v1  ;;  %1498 = vmatmul.msk.f32.gmra.mxu3 %vm280_vm0, %v258_v2  ;;  %v232_v1 = vld [vmem:[%s1594_s25 + $0x2a8] sm:$0xff] }
  0x8e   : > { %v264_v2 = vld [vmem:[%s1594_s25 + $0x3a8] sm:$0xff] }
  0x8f   : > { %1402 = vmatmul.msk.f32.gmra.mxu0 %vm280_vm0, %v162_v3  ;;  %1434 = vmatmul.msk.f32.gmra.mxu1 %vm280_vm0, %v194_v4 }
  0x94   : > { %v682_v7 = vpop.f32.mrf.mxu0  ;;  %v778_v8 = vpop.f32.mrf.mxu1 }
  0x95   : > { %1467 = vmatmul.msk.f32.gmra.mxu2 %vm280_vm0, %v227_v5  ;;  %1499 = vmatmul.msk.f32.gmra.mxu3 %vm280_vm0, %v259_v6  ;;  %v1066_v11 = vmax.f32 %v682_v7, 0.0  ;;  %v1098_v12 = vmax.f32 %v778_v8, 0.0  ;;  %v168_v5 = vld [vmem:[%s1594_s25 + $0xa8] sm:$0xff] }
  0x96   : > { %v200_v6 = vld [vmem:[%s1594_s25 + $0x1a8] sm:$0xff] }
  0x97   : > { %1194 = vst [vmem:[%s1731_s28] sm:$0xff] %v1066_v11  ;;  %1403 = vmatmul.msk.f32.gmra.mxu0 %vm280_vm0, %v163_v9  ;;  %1435 = vmatmul.msk.f32.gmra.mxu1 %vm280_vm0, %v195_v10 }
  0x98   : > { %1226 = vst [vmem:[%s1731_s28 + $0x100] sm:$0xff] %v1098_v12  ;;  %v874_v13 = vpop.f32.mrf.mxu2  ;;  %v970_v14 = vpop.f32.mrf.mxu3 }
  0x99   : > { %v1130_v15 = vmax.f32 %v874_v13, 0.0  ;;  %v1162_v16 = vmax.f32 %v970_v14, 0.0  ;;  %v233_v13 = vld [vmem:[%s1594_s25 + $0x2b0] sm:$0xff] }
  0x9a   : > { %v265_v14 = vld [vmem:[%s1594_s25 + $0x3b0] sm:$0xff] }
  0x9b   : > { %1258 = vst [vmem:[%s1731_s28 + $0x200] sm:$0xff] %v1130_v15 }
  0x9c   : > { %1290 = vst [vmem:[%s1731_s28 + $0x300] sm:$0xff] %v1162_v16  ;;  %v685_v19 = vpop.f32.mrf.mxu0  ;;  %v781_v20 = vpop.f32.mrf.mxu1 }
  0x9d   : > { %1468 = vmatmul.msk.f32.gmra.mxu2 %vm280_vm0, %v228_v17  ;;  %1500 = vmatmul.msk.f32.gmra.mxu3 %vm280_vm0, %v260_v18  ;;  %v1067_v23 = vmax.f32 %v685_v19, 0.0  ;;  %v1099_v24 = vmax.f32 %v781_v20, 0.0  ;;  %v169_v17 = vld [vmem:[%s1594_s25 + $0xb0] sm:$0xff] }
  0x9e   : > { %v201_v18 = vld [vmem:[%s1594_s25 + $0x1b0] sm:$0xff] }
  0x9f   : > { %1195 = vst [vmem:[%s1731_s28 + $0x8] sm:$0xff] %v1067_v23  ;;  %1404 = vmatmul.msk.f32.gmra.mxu0 %vm280_vm0, %v164_v21  ;;  %1436 = vmatmul.msk.f32.gmra.mxu1 %vm280_vm0, %v196_v22 }
  0xa0   : > { %1227 = vst [vmem:[%s1731_s28 + $0x108] sm:$0xff] %v1099_v24  ;;  %v877_v25 = vpop.f32.mrf.mxu2  ;;  %v973_v26 = vpop.f32.mrf.mxu3 }
  0xa1   : > { %v1131_v27 = vmax.f32 %v877_v25, 0.0  ;;  %v1163_v28 = vmax.f32 %v973_v26, 0.0  ;;  %v234_v25 = vld [vmem:[%s1594_s25 + $0x2b8] sm:$0xff] }
  0xa2   : > { %v266_v26 = vld [vmem:[%s1594_s25 + $0x3b8] sm:$0xff] }
  0xa3   : > { %1259 = vst [vmem:[%s1731_s28 + $0x208] sm:$0xff] %v1131_v27 }
  0xa4   : > { %1291 = vst [vmem:[%s1731_s28 + $0x308] sm:$0xff] %v1163_v28  ;;  %v688_v31 = vpop.f32.mrf.mxu0  ;;  %v784_v32 = vpop.f32.mrf.mxu1 }
  0xa5   : > { %1469 = vmatmul.msk.f32.gmra.mxu2 %vm280_vm0, %v229_v29  ;;  %1501 = vmatmul.msk.f32.gmra.mxu3 %vm280_vm0, %v261_v30  ;;  %v1068_v35 = vmax.f32 %v688_v31, 0.0  ;;  %v1100_v36 = vmax.f32 %v784_v32, 0.0  ;;  %v170_v29 = vld [vmem:[%s1594_s25 + $0xb8] sm:$0xff] }
  0xa6   : > { %v202_v30 = vld [vmem:[%s1594_s25 + $0x1b8] sm:$0xff] }
  0xa7   : > { %1196 = vst [vmem:[%s1731_s28 + $0x10] sm:$0xff] %v1068_v35  ;;  %1405 = vmatmul.msk.f32.gmra.mxu0 %vm280_vm0, %v165_v33  ;;  %1437 = vmatmul.msk.f32.gmra.mxu1 %vm280_vm0, %v197_v34 }
  0xa8   : > { %1228 = vst [vmem:[%s1731_s28 + $0x110] sm:$0xff] %v1100_v36  ;;  %v880_v37 = vpop.f32.mrf.mxu2  ;;  %v976_v38 = vpop.f32.mrf.mxu3 }
  0xa9   : > { %v1132_v39 = vmax.f32 %v880_v37, 0.0  ;;  %v1164_v40 = vmax.f32 %v976_v38, 0.0  ;;  %v235_v37 = vld [vmem:[%s1594_s25 + $0x2c0] sm:$0xff] }
  0xaa   : > { %v267_v38 = vld [vmem:[%s1594_s25 + $0x3c0] sm:$0xff] }
  0xab   : > { %1260 = vst [vmem:[%s1731_s28 + $0x210] sm:$0xff] %v1132_v39 }
  0xac   : > { %1292 = vst [vmem:[%s1731_s28 + $0x310] sm:$0xff] %v1164_v40  ;;  %v691_v43 = vpop.f32.mrf.mxu0  ;;  %v787_v44 = vpop.f32.mrf.mxu1 }
  0xad   : > { %1470 = vmatmul.msk.f32.gmra.mxu2 %vm280_vm0, %v230_v41  ;;  %1502 = vmatmul.msk.f32.gmra.mxu3 %vm280_vm0, %v262_v42  ;;  %v1069_v47 = vmax.f32 %v691_v43, 0.0  ;;  %v1101_v48 = vmax.f32 %v787_v44, 0.0  ;;  %v171_v41 = vld [vmem:[%s1594_s25 + $0xc0] sm:$0xff] }
  0xae   : > { %v203_v42 = vld [vmem:[%s1594_s25 + $0x1c0] sm:$0xff] }
  0xaf   : > { %1197 = vst [vmem:[%s1731_s28 + $0x18] sm:$0xff] %v1069_v47  ;;  %1406 = vmatmul.msk.f32.gmra.mxu0 %vm280_vm0, %v166_v45  ;;  %1438 = vmatmul.msk.f32.gmra.mxu1 %vm280_vm0, %v198_v46 }
  0xb0   : > { %1229 = vst [vmem:[%s1731_s28 + $0x118] sm:$0xff] %v1101_v48  ;;  %v883_v49 = vpop.f32.mrf.mxu2  ;;  %v979_v50 = vpop.f32.mrf.mxu3 }
  0xb1   : > { %v1133_v51 = vmax.f32 %v883_v49, 0.0  ;;  %v1165_v52 = vmax.f32 %v979_v50, 0.0  ;;  %v236_v49 = vld [vmem:[%s1594_s25 + $0x2c8] sm:$0xff] }
  0xb2   : > { %v268_v50 = vld [vmem:[%s1594_s25 + $0x3c8] sm:$0xff] }
  0xb3   : > { %1261 = vst [vmem:[%s1731_s28 + $0x218] sm:$0xff] %v1133_v51 }
  0xb4   : > { %1293 = vst [vmem:[%s1731_s28 + $0x318] sm:$0xff] %v1165_v52  ;;  %v694_v55 = vpop.f32.mrf.mxu0  ;;  %v790_v56 = vpop.f32.mrf.mxu1 }
  0xb5   : > { %1471 = vmatmul.msk.f32.gmra.mxu2 %vm280_vm0, %v231_v53  ;;  %1503 = vmatmul.msk.f32.gmra.mxu3 %vm280_vm0, %v263_v54  ;;  %v1070_v59 = vmax.f32 %v694_v55, 0.0  ;;  %v1102_v60 = vmax.f32 %v790_v56, 0.0  ;;  %v172_v53 = vld [vmem:[%s1594_s25 + $0xc8] sm:$0xff] }
  0xb6   : > { %v204_v54 = vld [vmem:[%s1594_s25 + $0x1c8] sm:$0xff] }
  0xb7   : > { %1198 = vst [vmem:[%s1731_s28 + $0x20] sm:$0xff] %v1070_v59  ;;  %1407 = vmatmul.msk.f32.gmra.mxu0 %vm280_vm0, %v167_v57  ;;  %1439 = vmatmul.msk.f32.gmra.mxu1 %vm280_vm0, %v199_v58 }
  0xb8   : > { %1230 = vst [vmem:[%s1731_s28 + $0x120] sm:$0xff] %v1102_v60  ;;  %v886_v61 = vpop.f32.mrf.mxu2  ;;  %v982_v62 = vpop.f32.mrf.mxu3 }
  0xb9   : > { %v1134_v63 = vmax.f32 %v886_v61, 0.0  ;;  %v1166_v0 = vmax.f32 %v982_v62, 0.0  ;;  %v237_v61 = vld [vmem:[%s1594_s25 + $0x2d0] sm:$0xff] }
  0xba   : > { %v269_v62 = vld [vmem:[%s1594_s25 + $0x3d0] sm:$0xff] }
  0xbb   : > { %1262 = vst [vmem:[%s1731_s28 + $0x220] sm:$0xff] %v1134_v63 }
  0xbc   : > { %1294 = vst [vmem:[%s1731_s28 + $0x320] sm:$0xff] %v1166_v0  ;;  %v697_v3 = vpop.f32.mrf.mxu0  ;;  %v793_v4 = vpop.f32.mrf.mxu1 }
  0xbd   : > { %1472 = vmatmul.msk.f32.gmra.mxu2 %vm280_vm0, %v232_v1  ;;  %1504 = vmatmul.msk.f32.gmra.mxu3 %vm280_vm0, %v264_v2  ;;  %v1071_v7 = vmax.f32 %v697_v3, 0.0  ;;  %v1103_v8 = vmax.f32 %v793_v4, 0.0  ;;  %v173_v1 = vld [vmem:[%s1594_s25 + $0xd0] sm:$0xff] }
  0xbe   : > { %v205_v2 = vld [vmem:[%s1594_s25 + $0x1d0] sm:$0xff] }
  0xbf   : > { %1199 = vst [vmem:[%s1731_s28 + $0x28] sm:$0xff] %v1071_v7  ;;  %1408 = vmatmul.msk.f32.gmra.mxu0 %vm280_vm0, %v168_v5  ;;  %1440 = vmatmul.msk.f32.gmra.mxu1 %vm280_vm0, %v200_v6 }
  0xc0   : > { %1231 = vst [vmem:[%s1731_s28 + $0x128] sm:$0xff] %v1103_v8  ;;  %v889_v9 = vpop.f32.mrf.mxu2  ;;  %v985_v10 = vpop.f32.mrf.mxu3 }
  0xc1   : > { %v1135_v11 = vmax.f32 %v889_v9, 0.0  ;;  %v1167_v12 = vmax.f32 %v985_v10, 0.0  ;;  %v238_v9 = vld [vmem:[%s1594_s25 + $0x2d8] sm:$0xff] }
  0xc2   : > { %v270_v10 = vld [vmem:[%s1594_s25 + $0x3d8] sm:$0xff] }
  0xc3   : > { %1263 = vst [vmem:[%s1731_s28 + $0x228] sm:$0xff] %v1135_v11 }
  0xc4   : > { %1295 = vst [vmem:[%s1731_s28 + $0x328] sm:$0xff] %v1167_v12  ;;  %v700_v15 = vpop.f32.mrf.mxu0  ;;  %v796_v16 = vpop.f32.mrf.mxu1 }
  0xc5   : > { %1473 = vmatmul.msk.f32.gmra.mxu2 %vm280_vm0, %v233_v13  ;;  %1505 = vmatmul.msk.f32.gmra.mxu3 %vm280_vm0, %v265_v14  ;;  %v1072_v19 = vmax.f32 %v700_v15, 0.0  ;;  %v1104_v20 = vmax.f32 %v796_v16, 0.0  ;;  %v174_v13 = vld [vmem:[%s1594_s25 + $0xd8] sm:$0xff] }
  0xc6   : > { %v206_v14 = vld [vmem:[%s1594_s25 + $0x1d8] sm:$0xff] }
  0xc7   : > { %1200 = vst [vmem:[%s1731_s28 + $0x30] sm:$0xff] %v1072_v19  ;;  %1409 = vmatmul.msk.f32.gmra.mxu0 %vm280_vm0, %v169_v17  ;;  %1441 = vmatmul.msk.f32.gmra.mxu1 %vm280_vm0, %v201_v18 }
  0xc8   : > { %1232 = vst [vmem:[%s1731_s28 + $0x130] sm:$0xff] %v1104_v20  ;;  %v892_v21 = vpop.f32.mrf.mxu2  ;;  %v988_v22 = vpop.f32.mrf.mxu3 }
  0xc9   : > { %v1136_v23 = vmax.f32 %v892_v21, 0.0  ;;  %v1168_v24 = vmax.f32 %v988_v22, 0.0  ;;  %v239_v21 = vld [vmem:[%s1594_s25 + $0x2e0] sm:$0xff] }
  0xca   : > { %v271_v22 = vld [vmem:[%s1594_s25 + $0x3e0] sm:$0xff] }
  0xcb   : > { %1264 = vst [vmem:[%s1731_s28 + $0x230] sm:$0xff] %v1136_v23 }
  0xcc   : > { %1296 = vst [vmem:[%s1731_s28 + $0x330] sm:$0xff] %v1168_v24  ;;  %v703_v27 = vpop.f32.mrf.mxu0  ;;  %v799_v28 = vpop.f32.mrf.mxu1 }
  0xcd   : > { %1474 = vmatmul.msk.f32.gmra.mxu2 %vm280_vm0, %v234_v25  ;;  %1506 = vmatmul.msk.f32.gmra.mxu3 %vm280_vm0, %v266_v26  ;;  %v1073_v31 = vmax.f32 %v703_v27, 0.0  ;;  %v1105_v32 = vmax.f32 %v799_v28, 0.0  ;;  %v175_v25 = vld [vmem:[%s1594_s25 + $0xe0] sm:$0xff] }
  0xce   : > { %v207_v26 = vld [vmem:[%s1594_s25 + $0x1e0] sm:$0xff] }
  0xcf   : > { %1201 = vst [vmem:[%s1731_s28 + $0x38] sm:$0xff] %v1073_v31  ;;  %1410 = vmatmul.msk.f32.gmra.mxu0 %vm280_vm0, %v170_v29  ;;  %1442 = vmatmul.msk.f32.gmra.mxu1 %vm280_vm0, %v202_v30 }
  0xd0   : > { %1233 = vst [vmem:[%s1731_s28 + $0x138] sm:$0xff] %v1105_v32  ;;  %v895_v33 = vpop.f32.mrf.mxu2  ;;  %v991_v34 = vpop.f32.mrf.mxu3 }
  0xd1   : > { %v1137_v35 = vmax.f32 %v895_v33, 0.0  ;;  %v1169_v36 = vmax.f32 %v991_v34, 0.0  ;;  %v240_v33 = vld [vmem:[%s1594_s25 + $0x2e8] sm:$0xff] }
  0xd2   : > { %v272_v34 = vld [vmem:[%s1594_s25 + $0x3e8] sm:$0xff] }
  0xd3   : > { %1265 = vst [vmem:[%s1731_s28 + $0x238] sm:$0xff] %v1137_v35 }
  0xd4   : > { %1297 = vst [vmem:[%s1731_s28 + $0x338] sm:$0xff] %v1169_v36  ;;  %v706_v39 = vpop.f32.mrf.mxu0  ;;  %v802_v40 = vpop.f32.mrf.mxu1 }
  0xd5   : > { %1475 = vmatmul.msk.f32.gmra.mxu2 %vm280_vm0, %v235_v37  ;;  %1507 = vmatmul.msk.f32.gmra.mxu3 %vm280_vm0, %v267_v38  ;;  %v1074_v43 = vmax.f32 %v706_v39, 0.0  ;;  %v1106_v44 = vmax.f32 %v802_v40, 0.0  ;;  %v176_v37 = vld [vmem:[%s1594_s25 + $0xe8] sm:$0xff] }
  0xd6   : > { %v208_v38 = vld [vmem:[%s1594_s25 + $0x1e8] sm:$0xff] }
  0xd7   : > { %1202 = vst [vmem:[%s1731_s28 + $0x40] sm:$0xff] %v1074_v43  ;;  %1411 = vmatmul.msk.f32.gmra.mxu0 %vm280_vm0, %v171_v41  ;;  %1443 = vmatmul.msk.f32.gmra.mxu1 %vm280_vm0, %v203_v42 }
  0xd8   : > { %1234 = vst [vmem:[%s1731_s28 + $0x140] sm:$0xff] %v1106_v44  ;;  %v898_v45 = vpop.f32.mrf.mxu2  ;;  %v994_v46 = vpop.f32.mrf.mxu3 }
  0xd9   : > { %v1138_v47 = vmax.f32 %v898_v45, 0.0  ;;  %v1170_v48 = vmax.f32 %v994_v46, 0.0  ;;  %v241_v45 = vld [vmem:[%s1594_s25 + $0x2f0] sm:$0xff] }
  0xda   : > { %v273_v46 = vld [vmem:[%s1594_s25 + $0x3f0] sm:$0xff] }
  0xdb   : > { %1266 = vst [vmem:[%s1731_s28 + $0x240] sm:$0xff] %v1138_v47 }
  0xdc   : > { %1298 = vst [vmem:[%s1731_s28 + $0x340] sm:$0xff] %v1170_v48  ;;  %v709_v51 = vpop.f32.mrf.mxu0  ;;  %v805_v52 = vpop.f32.mrf.mxu1 }
  0xdd   : > { %1476 = vmatmul.msk.f32.gmra.mxu2 %vm280_vm0, %v236_v49  ;;  %1508 = vmatmul.msk.f32.gmra.mxu3 %vm280_vm0, %v268_v50  ;;  %v1075_v55 = vmax.f32 %v709_v51, 0.0  ;;  %v1107_v56 = vmax.f32 %v805_v52, 0.0  ;;  %v177_v49 = vld [vmem:[%s1594_s25 + $0xf0] sm:$0xff] }
  0xde   : > { %v209_v50 = vld [vmem:[%s1594_s25 + $0x1f0] sm:$0xff] }
  0xdf   : > { %1203 = vst [vmem:[%s1731_s28 + $0x48] sm:$0xff] %v1075_v55  ;;  %1412 = vmatmul.msk.f32.gmra.mxu0 %vm280_vm0, %v172_v53  ;;  %1444 = vmatmul.msk.f32.gmra.mxu1 %vm280_vm0, %v204_v54 }
  0xe0   : > { %1235 = vst [vmem:[%s1731_s28 + $0x148] sm:$0xff] %v1107_v56  ;;  %v901_v57 = vpop.f32.mrf.mxu2  ;;  %v997_v58 = vpop.f32.mrf.mxu3 }
  0xe1   : > { %v1139_v59 = vmax.f32 %v901_v57, 0.0  ;;  %v1171_v60 = vmax.f32 %v997_v58, 0.0  ;;  %v242_v57 = vld [vmem:[%s1594_s25 + $0x2f8] sm:$0xff] }
  0xe2   : > { %v274_v58 = vld [vmem:[%s1594_s25 + $0x3f8] sm:$0xff] }
  0xe3   : > { %1267 = vst [vmem:[%s1731_s28 + $0x248] sm:$0xff] %v1139_v59 }
  0xe4   : > { %1299 = vst [vmem:[%s1731_s28 + $0x348] sm:$0xff] %v1171_v60  ;;  %v712_v63 = vpop.f32.mrf.mxu0  ;;  %v808_v0 = vpop.f32.mrf.mxu1 }
  0xe5   : > { %1477 = vmatmul.msk.f32.gmra.mxu2 %vm280_vm0, %v237_v61  ;;  %1509 = vmatmul.msk.f32.gmra.mxu3 %vm280_vm0, %v269_v62  ;;  %v1076_v3 = vmax.f32 %v712_v63, 0.0  ;;  %v1108_v4 = vmax.f32 %v808_v0, 0.0  ;;  %v178_v61 = vld [vmem:[%s1594_s25 + $0xf8] sm:$0xff] }
  0xe6   : > { %v210_v62 = vld [vmem:[%s1594_s25 + $0x1f8] sm:$0xff] }
  0xe7   : > { %1204 = vst [vmem:[%s1731_s28 + $0x50] sm:$0xff] %v1076_v3  ;;  %1413 = vmatmul.msk.f32.gmra.mxu0 %vm280_vm0, %v173_v1  ;;  %1445 = vmatmul.msk.f32.gmra.mxu1 %vm280_vm0, %v205_v2 }
  0xe8   : > { %1236 = vst [vmem:[%s1731_s28 + $0x150] sm:$0xff] %v1108_v4  ;;  %v904_v5 = vpop.f32.mrf.mxu2  ;;  %v1000_v6 = vpop.f32.mrf.mxu3 }
  0xe9   : > { %v1140_v7 = vmax.f32 %v904_v5, 0.0  ;;  %v1172_v8 = vmax.f32 %v1000_v6, 0.0 }
  0xeb   : > { %1268 = vst [vmem:[%s1731_s28 + $0x250] sm:$0xff] %v1140_v7 }
  0xec   : > { %1300 = vst [vmem:[%s1731_s28 + $0x350] sm:$0xff] %v1172_v8  ;;  %v715_v11 = vpop.f32.mrf.mxu0  ;;  %v811_v12 = vpop.f32.mrf.mxu1 }
  0xed   : > { %1478 = vmatmul.msk.f32.gmra.mxu2 %vm280_vm0, %v238_v9  ;;  %1510 = vmatmul.msk.f32.gmra.mxu3 %vm280_vm0, %v270_v10  ;;  %v1077_v15 = vmax.f32 %v715_v11, 0.0  ;;  %v1109_v16 = vmax.f32 %v811_v12, 0.0 }
  0xef   : > { %1205 = vst [vmem:[%s1731_s28 + $0x58] sm:$0xff] %v1077_v15  ;;  %1414 = vmatmul.msk.f32.gmra.mxu0 %vm280_vm0, %v174_v13  ;;  %1446 = vmatmul.msk.f32.gmra.mxu1 %vm280_vm0, %v206_v14 }
  0xf0   : > { %1237 = vst [vmem:[%s1731_s28 + $0x158] sm:$0xff] %v1109_v16  ;;  %v907_v17 = vpop.f32.mrf.mxu2  ;;  %v1003_v18 = vpop.f32.mrf.mxu3 }
  0xf1   : > { %v1141_v19 = vmax.f32 %v907_v17, 0.0  ;;  %v1173_v20 = vmax.f32 %v1003_v18, 0.0 }
  0xf3   : > { %1269 = vst [vmem:[%s1731_s28 + $0x258] sm:$0xff] %v1141_v19 }
  0xf4   : > { %1301 = vst [vmem:[%s1731_s28 + $0x358] sm:$0xff] %v1173_v20  ;;  %v718_v23 = vpop.f32.mrf.mxu0  ;;  %v814_v24 = vpop.f32.mrf.mxu1 }
  0xf5   : > { %1479 = vmatmul.msk.f32.gmra.mxu2 %vm280_vm0, %v239_v21  ;;  %1511 = vmatmul.msk.f32.gmra.mxu3 %vm280_vm0, %v271_v22  ;;  %v1078_v27 = vmax.f32 %v718_v23, 0.0  ;;  %v1110_v28 = vmax.f32 %v814_v24, 0.0 }
  0xf7   : > { %1206 = vst [vmem:[%s1731_s28 + $0x60] sm:$0xff] %v1078_v27  ;;  %1415 = vmatmul.msk.f32.gmra.mxu0 %vm280_vm0, %v175_v25  ;;  %1447 = vmatmul.msk.f32.gmra.mxu1 %vm280_vm0, %v207_v26 }
  0xf8   : > { %1238 = vst [vmem:[%s1731_s28 + $0x160] sm:$0xff] %v1110_v28  ;;  %v910_v29 = vpop.f32.mrf.mxu2  ;;  %v1006_v30 = vpop.f32.mrf.mxu3 }
  0xf9   : > { %v1142_v31 = vmax.f32 %v910_v29, 0.0  ;;  %v1174_v32 = vmax.f32 %v1006_v30, 0.0 }
  0xfb   : > { %1270 = vst [vmem:[%s1731_s28 + $0x260] sm:$0xff] %v1142_v31 }
  0xfc   : > { %1302 = vst [vmem:[%s1731_s28 + $0x360] sm:$0xff] %v1174_v32  ;;  %v721_v35 = vpop.f32.mrf.mxu0  ;;  %v817_v36 = vpop.f32.mrf.mxu1 }
  0xfd   : > { %1480 = vmatmul.msk.f32.gmra.mxu2 %vm280_vm0, %v240_v33  ;;  %1512 = vmatmul.msk.f32.gmra.mxu3 %vm280_vm0, %v272_v34  ;;  %v1079_v39 = vmax.f32 %v721_v35, 0.0  ;;  %v1111_v40 = vmax.f32 %v817_v36, 0.0 }
  0xff   : > { %1207 = vst [vmem:[%s1731_s28 + $0x68] sm:$0xff] %v1079_v39  ;;  %1416 = vmatmul.msk.f32.gmra.mxu0 %vm280_vm0, %v176_v37  ;;  %1448 = vmatmul.msk.f32.gmra.mxu1 %vm280_vm0, %v208_v38 }
 0x100   : > { %1239 = vst [vmem:[%s1731_s28 + $0x168] sm:$0xff] %v1111_v40  ;;  %v913_v41 = vpop.f32.mrf.mxu2  ;;  %v1009_v42 = vpop.f32.mrf.mxu3 }
 0x101   : > { %v1143_v43 = vmax.f32 %v913_v41, 0.0  ;;  %v1175_v44 = vmax.f32 %v1009_v42, 0.0 }
 0x103   : > { %1271 = vst [vmem:[%s1731_s28 + $0x268] sm:$0xff] %v1143_v43 }
 0x104   : > { %1303 = vst [vmem:[%s1731_s28 + $0x368] sm:$0xff] %v1175_v44  ;;  %v724_v47 = vpop.f32.mrf.mxu0  ;;  %v820_v48 = vpop.f32.mrf.mxu1 }
 0x105   : > { %1481 = vmatmul.msk.f32.gmra.mxu2 %vm280_vm0, %v241_v45  ;;  %1513 = vmatmul.msk.f32.gmra.mxu3 %vm280_vm0, %v273_v46  ;;  %v1080_v51 = vmax.f32 %v724_v47, 0.0  ;;  %v1112_v52 = vmax.f32 %v820_v48, 0.0 }
 0x107   : > { %1208 = vst [vmem:[%s1731_s28 + $0x70] sm:$0xff] %v1080_v51  ;;  %1417 = vmatmul.msk.f32.gmra.mxu0 %vm280_vm0, %v177_v49  ;;  %1449 = vmatmul.msk.f32.gmra.mxu1 %vm280_vm0, %v209_v50 }
 0x108   : > { %1240 = vst [vmem:[%s1731_s28 + $0x170] sm:$0xff] %v1112_v52  ;;  %v916_v53 = vpop.f32.mrf.mxu2  ;;  %v1012_v54 = vpop.f32.mrf.mxu3 }
 0x109   : > { %v1144_v55 = vmax.f32 %v916_v53, 0.0  ;;  %v1176_v56 = vmax.f32 %v1012_v54, 0.0 }
 0x10b   : > { %1272 = vst [vmem:[%s1731_s28 + $0x270] sm:$0xff] %v1144_v55 }
 0x10c   : > { %1304 = vst [vmem:[%s1731_s28 + $0x370] sm:$0xff] %v1176_v56  ;;  %v727_v59 = vpop.f32.mrf.mxu0  ;;  %v823_v60 = vpop.f32.mrf.mxu1 }
 0x10d   : > { %1482 = vmatmul.msk.f32.gmra.mxu2 %vm280_vm0, %v242_v57  ;;  %1514 = vmatmul.msk.f32.gmra.mxu3 %vm280_vm0, %v274_v58  ;;  %v1081_v63 = vmax.f32 %v727_v59, 0.0  ;;  %v1113_v0 = vmax.f32 %v823_v60, 0.0 }
 0x10f   : > { %1209 = vst [vmem:[%s1731_s28 + $0x78] sm:$0xff] %v1081_v63  ;;  %1418 = vmatmul.msk.f32.gmra.mxu0 %vm280_vm0, %v178_v61  ;;  %1450 = vmatmul.msk.f32.gmra.mxu1 %vm280_vm0, %v210_v62 }
 0x110   : > { %1241 = vst [vmem:[%s1731_s28 + $0x178] sm:$0xff] %v1113_v0  ;;  %v919_v1 = vpop.f32.mrf.mxu2  ;;  %v1015_v2 = vpop.f32.mrf.mxu3 }
 0x111   : > { %v1145_v3 = vmax.f32 %v919_v1, 0.0  ;;  %v1177_v4 = vmax.f32 %v1015_v2, 0.0 }
 0x113   : > { %1273 = vst [vmem:[%s1731_s28 + $0x278] sm:$0xff] %v1145_v3 }
 0x114   : > { %1305 = vst [vmem:[%s1731_s28 + $0x378] sm:$0xff] %v1177_v4  ;;  %v730_v5 = vpop.f32.mrf.mxu0  ;;  %v826_v6 = vpop.f32.mrf.mxu1 }
 0x115   : > { %v1082_v7 = vmax.f32 %v730_v5, 0.0  ;;  %v1114_v8 = vmax.f32 %v826_v6, 0.0 }
 0x117   : > { %1210 = vst [vmem:[%s1731_s28 + $0x80] sm:$0xff] %v1082_v7 }
 0x118   : > { %1242 = vst [vmem:[%s1731_s28 + $0x180] sm:$0xff] %v1114_v8  ;;  %v922_v9 = vpop.f32.mrf.mxu2  ;;  %v1018_v10 = vpop.f32.mrf.mxu3 }
 0x119   : > { %v1146_v11 = vmax.f32 %v922_v9, 0.0  ;;  %v1178_v12 = vmax.f32 %v1018_v10, 0.0 }
 0x11b   : > { %1274 = vst [vmem:[%s1731_s28 + $0x280] sm:$0xff] %v1146_v11 }
 0x11c   : > { %1306 = vst [vmem:[%s1731_s28 + $0x380] sm:$0xff] %v1178_v12  ;;  %v733_v13 = vpop.f32.mrf.mxu0  ;;  %v829_v14 = vpop.f32.mrf.mxu1 }
 0x11d   : > { %v1083_v15 = vmax.f32 %v733_v13, 0.0  ;;  %v1115_v16 = vmax.f32 %v829_v14, 0.0 }
 0x11f   : > { %1211 = vst [vmem:[%s1731_s28 + $0x88] sm:$0xff] %v1083_v15 }
 0x120   : > { %1243 = vst [vmem:[%s1731_s28 + $0x188] sm:$0xff] %v1115_v16  ;;  %v925_v17 = vpop.f32.mrf.mxu2  ;;  %v1021_v18 = vpop.f32.mrf.mxu3 }
 0x121   : > { %v1147_v19 = vmax.f32 %v925_v17, 0.0  ;;  %v1179_v20 = vmax.f32 %v1021_v18, 0.0 }
 0x123   : > { %1275 = vst [vmem:[%s1731_s28 + $0x288] sm:$0xff] %v1147_v19 }
 0x124   : > { %1307 = vst [vmem:[%s1731_s28 + $0x388] sm:$0xff] %v1179_v20  ;;  %v736_v21 = vpop.f32.mrf.mxu0  ;;  %v832_v22 = vpop.f32.mrf.mxu1 }
 0x125   : > { %v1084_v23 = vmax.f32 %v736_v21, 0.0  ;;  %v1116_v24 = vmax.f32 %v832_v22, 0.0 }
 0x127   : > { %1212 = vst [vmem:[%s1731_s28 + $0x90] sm:$0xff] %v1084_v23 }
 0x128   : > { %1244 = vst [vmem:[%s1731_s28 + $0x190] sm:$0xff] %v1116_v24  ;;  %v928_v25 = vpop.f32.mrf.mxu2  ;;  %v1024_v26 = vpop.f32.mrf.mxu3 }
 0x129   : > { %v1148_v27 = vmax.f32 %v928_v25, 0.0  ;;  %v1180_v28 = vmax.f32 %v1024_v26, 0.0 }
 0x12b   : > { %1276 = vst [vmem:[%s1731_s28 + $0x290] sm:$0xff] %v1148_v27 }
 0x12c   : > { %1308 = vst [vmem:[%s1731_s28 + $0x390] sm:$0xff] %v1180_v28  ;;  %v739_v29 = vpop.f32.mrf.mxu0  ;;  %v835_v30 = vpop.f32.mrf.mxu1 }
 0x12d   : > { %v1085_v31 = vmax.f32 %v739_v29, 0.0  ;;  %v1117_v32 = vmax.f32 %v835_v30, 0.0 }
 0x12f   : > { %1213 = vst [vmem:[%s1731_s28 + $0x98] sm:$0xff] %v1085_v31 }
 0x130   : > { %1245 = vst [vmem:[%s1731_s28 + $0x198] sm:$0xff] %v1117_v32  ;;  %v931_v33 = vpop.f32.mrf.mxu2  ;;  %v1027_v34 = vpop.f32.mrf.mxu3 }
 0x131   : > { %v1149_v35 = vmax.f32 %v931_v33, 0.0  ;;  %v1181_v36 = vmax.f32 %v1027_v34, 0.0 }
 0x133   : > { %1277 = vst [vmem:[%s1731_s28 + $0x298] sm:$0xff] %v1149_v35 }
 0x134   : > { %1309 = vst [vmem:[%s1731_s28 + $0x398] sm:$0xff] %v1181_v36  ;;  %v742_v37 = vpop.f32.mrf.mxu0  ;;  %v838_v38 = vpop.f32.mrf.mxu1 }
 0x135   : > { %v1086_v39 = vmax.f32 %v742_v37, 0.0  ;;  %v1118_v40 = vmax.f32 %v838_v38, 0.0 }
 0x137   : > { %1214 = vst [vmem:[%s1731_s28 + $0xa0] sm:$0xff] %v1086_v39 }
 0x138   : > { %1246 = vst [vmem:[%s1731_s28 + $0x1a0] sm:$0xff] %v1118_v40  ;;  %v934_v41 = vpop.f32.mrf.mxu2  ;;  %v1030_v42 = vpop.f32.mrf.mxu3 }
 0x139   : > { %v1150_v43 = vmax.f32 %v934_v41, 0.0  ;;  %v1182_v44 = vmax.f32 %v1030_v42, 0.0 }
 0x13b   : > { %1278 = vst [vmem:[%s1731_s28 + $0x2a0] sm:$0xff] %v1150_v43 }
 0x13c   : > { %1310 = vst [vmem:[%s1731_s28 + $0x3a0] sm:$0xff] %v1182_v44  ;;  %v745_v45 = vpop.f32.mrf.mxu0  ;;  %v841_v46 = vpop.f32.mrf.mxu1 }
 0x13d   : > { %v1087_v47 = vmax.f32 %v745_v45, 0.0  ;;  %v1119_v48 = vmax.f32 %v841_v46, 0.0 }
 0x13f   : > { %1215 = vst [vmem:[%s1731_s28 + $0xa8] sm:$0xff] %v1087_v47 }
 0x140   : > { %1247 = vst [vmem:[%s1731_s28 + $0x1a8] sm:$0xff] %v1119_v48  ;;  %v937_v49 = vpop.f32.mrf.mxu2  ;;  %v1033_v50 = vpop.f32.mrf.mxu3 }
 0x141   : > { %v1151_v51 = vmax.f32 %v937_v49, 0.0  ;;  %v1183_v52 = vmax.f32 %v1033_v50, 0.0 }
 0x143   : > { %1279 = vst [vmem:[%s1731_s28 + $0x2a8] sm:$0xff] %v1151_v51 }
 0x144   : > { %1311 = vst [vmem:[%s1731_s28 + $0x3a8] sm:$0xff] %v1183_v52  ;;  %v748_v53 = vpop.f32.mrf.mxu0  ;;  %v844_v54 = vpop.f32.mrf.mxu1 }
 0x145   : > { %v1088_v55 = vmax.f32 %v748_v53, 0.0  ;;  %v1120_v56 = vmax.f32 %v844_v54, 0.0 }
 0x147   : > { %1216 = vst [vmem:[%s1731_s28 + $0xb0] sm:$0xff] %v1088_v55 }
 0x148   : > { %1248 = vst [vmem:[%s1731_s28 + $0x1b0] sm:$0xff] %v1120_v56  ;;  %v940_v57 = vpop.f32.mrf.mxu2  ;;  %v1036_v58 = vpop.f32.mrf.mxu3 }
 0x149   : > { %v1152_v59 = vmax.f32 %v940_v57, 0.0  ;;  %v1184_v60 = vmax.f32 %v1036_v58, 0.0 }
 0x14b   : > { %1280 = vst [vmem:[%s1731_s28 + $0x2b0] sm:$0xff] %v1152_v59 }
 0x14c   : > { %1312 = vst [vmem:[%s1731_s28 + $0x3b0] sm:$0xff] %v1184_v60  ;;  %v751_v61 = vpop.f32.mrf.mxu0  ;;  %v847_v62 = vpop.f32.mrf.mxu1 }
 0x14d   : > { %v1089_v63 = vmax.f32 %v751_v61, 0.0  ;;  %v1121_v0 = vmax.f32 %v847_v62, 0.0 }
 0x14f   : > { %1217 = vst [vmem:[%s1731_s28 + $0xb8] sm:$0xff] %v1089_v63 }
 0x150   : > { %1249 = vst [vmem:[%s1731_s28 + $0x1b8] sm:$0xff] %v1121_v0  ;;  %v943_v1 = vpop.f32.mrf.mxu2  ;;  %v1039_v2 = vpop.f32.mrf.mxu3 }
 0x151   : > { %v1153_v3 = vmax.f32 %v943_v1, 0.0  ;;  %v1185_v4 = vmax.f32 %v1039_v2, 0.0 }
 0x153   : > { %1281 = vst [vmem:[%s1731_s28 + $0x2b8] sm:$0xff] %v1153_v3 }
 0x154   : > { %1313 = vst [vmem:[%s1731_s28 + $0x3b8] sm:$0xff] %v1185_v4  ;;  %v754_v5 = vpop.f32.mrf.mxu0  ;;  %v850_v6 = vpop.f32.mrf.mxu1 }
 0x155   : > { %v1090_v7 = vmax.f32 %v754_v5, 0.0  ;;  %v1122_v8 = vmax.f32 %v850_v6, 0.0 }
 0x157   : > { %1218 = vst [vmem:[%s1731_s28 + $0xc0] sm:$0xff] %v1090_v7 }
 0x158   : > { %1250 = vst [vmem:[%s1731_s28 + $0x1c0] sm:$0xff] %v1122_v8  ;;  %v946_v9 = vpop.f32.mrf.mxu2  ;;  %v1042_v10 = vpop.f32.mrf.mxu3 }
 0x159   : > { %v1154_v11 = vmax.f32 %v946_v9, 0.0  ;;  %v1186_v12 = vmax.f32 %v1042_v10, 0.0 }
 0x15b   : > { %1282 = vst [vmem:[%s1731_s28 + $0x2c0] sm:$0xff] %v1154_v11 }
 0x15c   : > { %1314 = vst [vmem:[%s1731_s28 + $0x3c0] sm:$0xff] %v1186_v12  ;;  %v757_v13 = vpop.f32.mrf.mxu0  ;;  %v853_v14 = vpop.f32.mrf.mxu1 }
 0x15d   : > { %v1091_v15 = vmax.f32 %v757_v13, 0.0  ;;  %v1123_v16 = vmax.f32 %v853_v14, 0.0 }
 0x15f   : > { %1219 = vst [vmem:[%s1731_s28 + $0xc8] sm:$0xff] %v1091_v15 }
 0x160   : > { %1251 = vst [vmem:[%s1731_s28 + $0x1c8] sm:$0xff] %v1123_v16  ;;  %v949_v17 = vpop.f32.mrf.mxu2  ;;  %v1045_v18 = vpop.f32.mrf.mxu3 }
 0x161   : > { %v1155_v19 = vmax.f32 %v949_v17, 0.0  ;;  %v1187_v20 = vmax.f32 %v1045_v18, 0.0 }
 0x163   : > { %1283 = vst [vmem:[%s1731_s28 + $0x2c8] sm:$0xff] %v1155_v19 }
 0x164   : > { %1315 = vst [vmem:[%s1731_s28 + $0x3c8] sm:$0xff] %v1187_v20  ;;  %v760_v21 = vpop.f32.mrf.mxu0  ;;  %v856_v22 = vpop.f32.mrf.mxu1 }
 0x165   : > { %v1092_v23 = vmax.f32 %v760_v21, 0.0  ;;  %v1124_v24 = vmax.f32 %v856_v22, 0.0 }
 0x167   : > { %1220 = vst [vmem:[%s1731_s28 + $0xd0] sm:$0xff] %v1092_v23 }
 0x168   : > { %1252 = vst [vmem:[%s1731_s28 + $0x1d0] sm:$0xff] %v1124_v24  ;;  %v952_v25 = vpop.f32.mrf.mxu2  ;;  %v1048_v26 = vpop.f32.mrf.mxu3 }
 0x169   : > { %v1156_v27 = vmax.f32 %v952_v25, 0.0  ;;  %v1188_v28 = vmax.f32 %v1048_v26, 0.0 }
 0x16b   : > { %1284 = vst [vmem:[%s1731_s28 + $0x2d0] sm:$0xff] %v1156_v27 }
 0x16c   : > { %1316 = vst [vmem:[%s1731_s28 + $0x3d0] sm:$0xff] %v1188_v28  ;;  %v763_v29 = vpop.f32.mrf.mxu0  ;;  %v859_v30 = vpop.f32.mrf.mxu1 }
 0x16d   : > { %v1093_v31 = vmax.f32 %v763_v29, 0.0  ;;  %v1125_v32 = vmax.f32 %v859_v30, 0.0 }
 0x16f   : > { %1221 = vst [vmem:[%s1731_s28 + $0xd8] sm:$0xff] %v1093_v31 }
 0x170   : > { %1253 = vst [vmem:[%s1731_s28 + $0x1d8] sm:$0xff] %v1125_v32  ;;  %v955_v33 = vpop.f32.mrf.mxu2  ;;  %v1051_v34 = vpop.f32.mrf.mxu3 }
 0x171   : > { %v1157_v35 = vmax.f32 %v955_v33, 0.0  ;;  %v1189_v36 = vmax.f32 %v1051_v34, 0.0 }
 0x173   : > { %1285 = vst [vmem:[%s1731_s28 + $0x2d8] sm:$0xff] %v1157_v35 }
 0x174   : > { %1317 = vst [vmem:[%s1731_s28 + $0x3d8] sm:$0xff] %v1189_v36  ;;  %v766_v37 = vpop.f32.mrf.mxu0  ;;  %v862_v38 = vpop.f32.mrf.mxu1 }
 0x175   : > { %v1094_v39 = vmax.f32 %v766_v37, 0.0  ;;  %v1126_v40 = vmax.f32 %v862_v38, 0.0 }
 0x177   : > { %1222 = vst [vmem:[%s1731_s28 + $0xe0] sm:$0xff] %v1094_v39 }
 0x178   : > { %1254 = vst [vmem:[%s1731_s28 + $0x1e0] sm:$0xff] %v1126_v40  ;;  %v958_v41 = vpop.f32.mrf.mxu2  ;;  %v1054_v42 = vpop.f32.mrf.mxu3 }
 0x179   : > { %v1158_v43 = vmax.f32 %v958_v41, 0.0  ;;  %v1190_v44 = vmax.f32 %v1054_v42, 0.0 }
 0x17b   : > { %1286 = vst [vmem:[%s1731_s28 + $0x2e0] sm:$0xff] %v1158_v43 }
 0x17c   : > { %1318 = vst [vmem:[%s1731_s28 + $0x3e0] sm:$0xff] %v1190_v44  ;;  %v769_v45 = vpop.f32.mrf.mxu0  ;;  %v865_v46 = vpop.f32.mrf.mxu1 }
 0x17d   : > { %v1095_v47 = vmax.f32 %v769_v45, 0.0  ;;  %v1127_v48 = vmax.f32 %v865_v46, 0.0 }
 0x17f   : > { %1223 = vst [vmem:[%s1731_s28 + $0xe8] sm:$0xff] %v1095_v47 }
 0x180   : > { %1255 = vst [vmem:[%s1731_s28 + $0x1e8] sm:$0xff] %v1127_v48  ;;  %v961_v49 = vpop.f32.mrf.mxu2  ;;  %v1057_v50 = vpop.f32.mrf.mxu3 }
 0x181   : > { %v1159_v51 = vmax.f32 %v961_v49, 0.0  ;;  %v1191_v52 = vmax.f32 %v1057_v50, 0.0 }
 0x183   : > { %1287 = vst [vmem:[%s1731_s28 + $0x2e8] sm:$0xff] %v1159_v51 }
 0x184   : > { %1319 = vst [vmem:[%s1731_s28 + $0x3e8] sm:$0xff] %v1191_v52  ;;  %v772_v53 = vpop.f32.mrf.mxu0  ;;  %v868_v54 = vpop.f32.mrf.mxu1 }
 0x185   : > { %v1096_v55 = vmax.f32 %v772_v53, 0.0  ;;  %v1128_v56 = vmax.f32 %v868_v54, 0.0 }
 0x187   : > { %1224 = vst [vmem:[%s1731_s28 + $0xf0] sm:$0xff] %v1096_v55 }
 0x188   : > { %1256 = vst [vmem:[%s1731_s28 + $0x1f0] sm:$0xff] %v1128_v56  ;;  %v964_v57 = vpop.f32.mrf.mxu2  ;;  %v1060_v58 = vpop.f32.mrf.mxu3 }
 0x189   : > { %v1160_v59 = vmax.f32 %v964_v57, 0.0  ;;  %v1192_v60 = vmax.f32 %v1060_v58, 0.0 }
 0x18b   : > { %1288 = vst [vmem:[%s1731_s28 + $0x2f0] sm:$0xff] %v1160_v59 }
 0x18c   : > { %1320 = vst [vmem:[%s1731_s28 + $0x3f0] sm:$0xff] %v1192_v60  ;;  %v775_v61 = vpop.f32.mrf.mxu0  ;;  %v871_v62 = vpop.f32.mrf.mxu1 }
 0x18d   : > { %v1097_v63 = vmax.f32 %v775_v61, 0.0  ;;  %v1129_v0 = vmax.f32 %v871_v62, 0.0 }
 0x18f   : > { %1225 = vst [vmem:[%s1731_s28 + $0xf8] sm:$0xff] %v1097_v63 }
 0x190   : > { %1257 = vst [vmem:[%s1731_s28 + $0x1f8] sm:$0xff] %v1129_v0  ;;  %v967_v1 = vpop.f32.mrf.mxu2  ;;  %v1063_v2 = vpop.f32.mrf.mxu3 }
 0x191   : > { %v1161_v3 = vmax.f32 %v967_v1, 0.0  ;;  %v1193_v4 = vmax.f32 %v1063_v2, 0.0 }
 0x193   : > { %1289 = vst [vmem:[%s1731_s28 + $0x2f8] sm:$0xff] %v1161_v3 }
 0x194   : > { %1321 = vst [vmem:[%s1731_s28 + $0x3f8] sm:$0xff] %v1193_v4 }
 0x195 PF: > { %s12_s9 = sadd.s32 1, %s1546_s9  }
 0x196   : > { %p9_p4 = scmp.ge.s32.totalorder %s12_s9, 4  }
 0x198   :  { %11 = sbr.rel (!%p9_p4) target bundleno = 1 (0x1), region = 58 }

</bundles_post_ra>
